<compile_context>
chip_gen: v5e
topology: v5e:2x2
jax: 0.10.0
libtpu: 0.0.40
codegen_flags: <defaults>
</compile_context>

<pallas_src>
import math

import jax
import jax.numpy as jnp
from jax.experimental import pallas as pl
from jax.experimental.pallas import tpu as pltpu


# Conservative cross-generation budget for all pipelined VMEM buffers.
# v7x has 64 MiB VMEM/TC (half of v5e/v6e) but the fastest HBM, so it needs
# the largest tiles while having the least room -- 40 MiB keeps headroom.
_VMEM_BUDGET_BYTES = 40 << 20
_MAX_OUT_TILE_BYTES = 8 << 20      # ~8 MiB of output written per grid step
_VMEM_LIMIT_CAP = 48 << 20


def _round_up(x, m):
    return ((x + m - 1) // m) * m


def _sublane(dtype):
    # Minimum second-to-last block-dim multiple for a packed dtype:
    # f32 -> 8, bf16 -> 16, int8/fp8 -> 32.
    return 8 * (4 // jnp.dtype(dtype).itemsize)


def _embed_kernel(x_ref, w_ref, pe_ref, o_ref):
    # x_ref : (TM, D_in)         rows of the flattened (B*L, D_in) input
    # w_ref : (D_in, d_model_p)  loop-invariant (constant index_map)
    # pe_ref: (TM, d_model_p)    PE + bias, pre-tiled to the row-tile height
    # o_ref : (TM, d_model_p)
    y = jnp.dot(x_ref[...], w_ref[...], preferred_element_type=jnp.float32)
    o_ref[...] = (y + pe_ref[...].astype(jnp.float32)).astype(o_ref.dtype)


def _choose_row_tile(M, L, d_in, d_model_p, x_dtype, pe_dtype, out_dtype):
    """Row-tile height TM: a multiple of lcm(L, sublane) sized so ~8 MiB of
    output is written per step and the conservatively-counted pipelined VMEM
    (2x every stream, lane-padded x block) stays inside the budget, while
    keeping >= 2 grid steps whenever M allows (v7x dual TensorCore)."""
    sub = max(_sublane(x_dtype), _sublane(pe_dtype), _sublane(out_dtype))
    unit = L * sub // math.gcd(L, sub)                  # lcm(L, sublane)

    x_it = jnp.dtype(x_dtype).itemsize
    pe_it = jnp.dtype(pe_dtype).itemsize
    out_it = jnp.dtype(out_dtype).itemsize

    # Per-row VMEM bytes across pipelined buffers.  The tiny D_in axis of the
    # x block is lane-padded to a full 128-lane vreg row; every stream is
    # counted as double-buffered (conservative for the invariant PE slab).
    row_bytes = 2 * (_round_up(d_in, 128) * x_it
                     + d_model_p * pe_it
                     + d_model_p * out_it)
    w_bytes = 2 * _round_up(d_in, 8) * d_model_p * 4    # invariant weight, small

    budget_rows = max(unit, (_VMEM_BUDGET_BYTES - w_bytes - (1 << 20)) // row_bytes)
    out_rows = max(unit, _MAX_OUT_TILE_BYTES // (d_model_p * out_it))
    tm = max(unit, min(budget_rows, out_rows) // unit * unit)
    tm = min(tm, _round_up(M, unit))
    # Keep at least 2 grid steps when possible so both v7x TensorCores work.
    if tm >= M and M > unit:
        tm = _round_up(-(-M // 2), unit)
    return tm


def make_data_embedding(weight, bias, pe, *, out_dtype=None):
    """Build the DataEmbedding forward function.

    weight: (D_in, d_model), bias: (d_model,), pe: (L_max, d_model).
    The channel padding, bias fold and PE slab tiling are done once here
    (hoisted out of the per-call path)."""
    d_in, d_model = weight.shape
    d_model_p = max(_round_up(d_model, 128), 128)
    pad_c = d_model_p - d_model

    # Pad the channel axis to a lane-dense multiple of 128 once, up front.
    weight_p = jnp.pad(weight, ((0, 0), (0, pad_c))) if pad_c else weight
    # Fold bias into the PE table (one fused add in-kernel, one fewer stream).
    pe_bias = pe + bias[None, :]
    pe_bias_p = jnp.pad(pe_bias, ((0, 0), (0, pad_c))) if pad_c else pe_bias

    pe_tile_cache = {}   # (L, TM) -> (TM, d_model_p) PE+bias slab

    def forward(x):
        B, L, d_in_x = x.shape
        assert d_in_x == d_in, "input feature dim mismatch"
        assert L <= pe_bias_p.shape[0], "sequence longer than PE table"
        odt = jnp.dtype(out_dtype) if out_dtype is not None else jnp.dtype(x.dtype)

        M = B * L
        tm = _choose_row_tile(M, L, d_in, d_model_p, x.dtype, pe_bias_p.dtype, odt)
        m_pad = _round_up(M, tm)
        tb = tm // L

        key = (L, tm)
        if key not in pe_tile_cache:
            pe_tile_cache[key] = jnp.tile(pe_bias_p[:L], (tb, 1))
        pe_tile = pe_tile_cache[key]

        x2d = x.reshape(M, d_in)
        if m_pad != M:
            x2d = jnp.pad(x2d, ((0, m_pad - M), (0, 0)))

        x_it = jnp.dtype(x.dtype).itemsize
        pe_it = jnp.dtype(pe_tile.dtype).itemsize
        out_it = odt.itemsize
        vmem_need = (2 * tm * (_round_up(d_in, 128) * x_it
                               + d_model_p * pe_it
                               + d_model_p * out_it)
                     + 2 * _round_up(d_in, 8) * d_model_p
                     * jnp.dtype(weight_p.dtype).itemsize)
        vmem_limit = int(min(_VMEM_LIMIT_CAP,
                             max(16 << 20, vmem_need + vmem_need // 4 + (2 << 20))))

        cost = pl.CostEstimate(
            flops=2 * m_pad * d_in * d_model_p,
            transcendentals=0,
            bytes_accessed=(m_pad * d_in * x_it
                            + d_in * d_model_p * jnp.dtype(weight_p.dtype).itemsize
                            + tm * d_model_p * pe_it
                            + m_pad * d_model_p * out_it),
        )

        out2d = pl.pallas_call(
            _embed_kernel,
            out_shape=jax.ShapeDtypeStruct((m_pad, d_model_p), odt),
            grid_spec=pltpu.PrefetchScalarGridSpec(
                num_scalar_prefetch=0,
                grid=(m_pad // tm,),
                in_specs=[
                    pl.BlockSpec((tm, d_in), lambda i: (i, 0)),
                    pl.BlockSpec((d_in, d_model_p), lambda i: (0, 0)),   # invariant
                    pl.BlockSpec((tm, d_model_p), lambda i: (0, 0)),     # invariant
                ],
                out_specs=pl.BlockSpec((tm, d_model_p), lambda i: (i, 0)),
            ),
            compiler_params=pltpu.CompilerParams(
                dimension_semantics=("parallel",),
                vmem_limit_bytes=vmem_limit,
            ),
            cost_estimate=cost,
        )(x2d, weight_p, pe_tile)

        return out2d[:M, :d_model].reshape(B, L, d_model)

    return forward


def make_positional_encoding(L, d_model, dtype=jnp.float32):
    """Sinusoidal PE identical to the PyTorch PositionalEncoding buffer, rows [0, L)."""
    position = jnp.arange(0, L, dtype=jnp.float32)[:, None]                  # (L, 1)
    div_term = jnp.exp(jnp.arange(0, d_model, 2, dtype=jnp.float32)
                       * -(math.log(10000.0) / d_model))                     # (d_model/2,)
    ang = position * div_term                                                # (L, d_model/2)
    pe = jnp.zeros((L, d_model), dtype=jnp.float32)
    pe = pe.at[:, 0::2].set(jnp.sin(ang))
    pe = pe.at[:, 1::2].set(jnp.cos(ang))
    return pe.astype(dtype)


if __name__ == "__main__":
    # Small shapes: batch=2, seq=8, input_dim=4, d_model=64.
    # d_model=64 deliberately exercises the pad-to-128-lanes output path.
    B, L, D_in, d_model = 2, 8, 4, 64

    key = jax.random.PRNGKey(0)
    kx, kw, kb = jax.random.split(key, 3)

    # Deterministic parameter init (PyTorch nn.Linear style: U(-1/sqrt(in), 1/sqrt(in)))
    bound = 1.0 / math.sqrt(D_in)
    weight = jax.random.uniform(kw, (D_in, d_model), jnp.float32, -bound, bound)
    bias = jax.random.uniform(kb, (d_model,), jnp.float32, -bound, bound)

    x = jax.random.normal(kx, (B, L, D_in), jnp.float32)
    pe = make_positional_encoding(L, d_model)

    # Pure-JAX reference (dropout is identity in eval mode).
    ref = x @ weight + bias[None, None, :] + pe[None, :, :]

    # f32 output path (matches the PyTorch module's dtype exactly).
    embed_f32 = make_data_embedding(weight, bias, pe)
    out = jax.block_until_ready(embed_f32(x))
    assert out.shape == (B, L, d_model)
    assert out.dtype == jnp.float32
    assert jnp.allclose(out, ref, atol=1e-5, rtol=1e-5)

    # bf16 output path (halves the dominant HBM write stream; f32 accumulate).
    embed_bf16 = make_data_embedding(weight, bias, pe, out_dtype=jnp.bfloat16)
    out_bf16 = jax.block_until_ready(embed_bf16(x))
    assert out_bf16.shape == (B, L, d_model)
    assert out_bf16.dtype == jnp.bfloat16
    assert jnp.allclose(out_bf16.astype(jnp.float32), ref, atol=5e-2, rtol=5e-2)

    print("KERNEL_OK")
</pallas_src>

<mosaic_0001>
module attributes {stable_mosaic.version = 11 : i64} {
  func.func @_embed_kernel(%arg0: i32, %arg1: memref<8x4xf32, #tpu.memory_space<vmem>>, %arg2: memref<4x128xf32, #tpu.memory_space<vmem>>, %arg3: memref<8x128xf32, #tpu.memory_space<vmem>>, %arg4: memref<8x128xf32, #tpu.memory_space<vmem>>) attributes {dimension_semantics = [#tpu.dimension_semantics<parallel>], iteration_bounds = array<i64: 2>, scalar_prefetch = 0 : i64, scratch_operands = 0 : i64, tpu.core_type = #tpu.core_type<tc>, window_params = [{transform_indices = @transform_0, window_bounds = array<i64: 8, 4>}, {pipeline_mode = #tpu.pipeline_mode<synchronous>, transform_indices = @transform_1, window_bounds = array<i64: 4, 128>}, {pipeline_mode = #tpu.pipeline_mode<synchronous>, transform_indices = @transform_2, window_bounds = array<i64: 8, 128>}, {transform_indices = @transform_3, window_bounds = array<i64: 8, 128>}]} {
    %c0 = arith.constant 0 : index
    %c0_0 = arith.constant 0 : index
    %0 = vector.load %arg1[%c0, %c0_0] : memref<8x4xf32, #tpu.memory_space<vmem>>, vector<8x4xf32>
    %c0_1 = arith.constant 0 : index
    %c0_2 = arith.constant 0 : index
    %1 = vector.load %arg2[%c0_1, %c0_2] : memref<4x128xf32, #tpu.memory_space<vmem>>, vector<4x128xf32>
    %cst = arith.constant dense<0.000000e+00> : vector<8x128xf32>
    %2 = tpu.matmul %0, %1, %cst {dimension_numbers = #tpu.dot_dimension_numbers<[1], [0], [0], [1], [0, 0, 1, 1], [], []>} : vector<8x4xf32>, vector<4x128xf32>, vector<8x128xf32> -> vector<8x128xf32>
    %c0_3 = arith.constant 0 : index
    %c0_4 = arith.constant 0 : index
    %3 = vector.load %arg3[%c0_3, %c0_4] : memref<8x128xf32, #tpu.memory_space<vmem>>, vector<8x128xf32>
    %4 = arith.addf %2, %3 : vector<8x128xf32>
    %c0_5 = arith.constant 0 : index
    %c0_6 = arith.constant 0 : index
    %5 = vector.load %arg4[%c0_5, %c0_6] : memref<8x128xf32, #tpu.memory_space<vmem>>, vector<8x128xf32>
    tpu.vector_store %arg4[%c0_5, %c0_6], %4 {strides = array<i32>} : memref<8x128xf32, #tpu.memory_space<vmem>>, vector<8x128xf32>,
    return
  }
  func.func @transform_0(%arg0: i32) -> (i32, i32) {
    %c0_i32 = arith.constant 0 : i32
    %c0_i32_0 = arith.constant 0 : i32
    return %arg0, %c0_i32 : i32, i32
  }
  func.func @transform_1(%arg0: i32) -> (i32, i32) {
    %c0_i32 = arith.constant 0 : i32
    %c0_i32_0 = arith.constant 0 : i32
    %c0_i32_1 = arith.constant 0 : i32
    return %c0_i32, %c0_i32_0 : i32, i32
  }
  func.func @transform_2(%arg0: i32) -> (i32, i32) {
    %c0_i32 = arith.constant 0 : i32
    %c0_i32_0 = arith.constant 0 : i32
    %c0_i32_1 = arith.constant 0 : i32
    return %c0_i32, %c0_i32_0 : i32, i32
  }
  func.func @transform_3(%arg0: i32) -> (i32, i32) {
    %c0_i32 = arith.constant 0 : i32
    %c0_i32_0 = arith.constant 0 : i32
    return %arg0, %c0_i32 : i32, i32
  }
}

</mosaic_0001>

<bundles_post_ra>
// kernel: tpu_custom_call.1
= control target key start
LH: loop header
LB: loop body
LE: loop exit
PB: predicated region body
PF: predicated region fallthrough
CT: control target
= control target key end

     0   :  { %8 = vsyncpa [#allocation3], 0  ;;  %s499_s0 = inlined_call_operand.vmem [shape: f32[16,4], index: 0, kind: input, shape index: {}]   ;;  %s500_s1 = inlined_call_operand.vmem [shape: f32[4,128], index: 1, kind: input, shape index: {}]   ;;  %s501_s2 = inlined_call_operand.vmem [shape: f32[8,128], index: 2, kind: input, shape index: {}]   ;;  %s502_s3 = inlined_call_operand.hbm [shape: f32[16,128], index: 3, kind: output, shape index: {}]  }
   0x1   :  { %10 = vsyncpa [#allocation3 + $0x1], 0  ;;  %s408_s12 = smov 0   ;;  %s410_s13 = smov 0  }
   0x2   :  { %s412_s14 = smov 0   ;;  %s414_s15 = smov 0  }
   0x3 LB: > { %s429_s16 = sadd.s32 4294967295, %s386_s15   ;;  %s273_s17 = sadd.s32 4294967294, %s386_s15   ;;  %s386_s15 = sphi %s414_s15, %s508_s15   ;;  %s382_s14 = sphi %s412_s14, %s507_s14   ;;  %s378_s13 = sphi %s410_s13, %s506_s13   ;;  %s374_s12 = sphi %s408_s12, %s505_s12  }
   0x4   : > { %s433_s18 = sadd.s32 1, %s386_s15   ;;  %s91_s19 = sadd.s32 1, %s382_s14 }
   0x5   : > { %s88_s20 = ssub.s32 %s386_s15, %s433_s18  ;;  %p101_p0 = scmp.ne.s32.totalorder %s382_s14, %s378_s13 }
   0x6   : > { %p89_p1 = scmp.eq.s32.totalorder %s88_s20, 0  ;;  %p102_p2 = scmp.eq.s32.totalorder %s429_s16, 1 }
   0x7   : > { %p107_p3 = scmp.ne.s32.totalorder %s378_s13, %s374_s12  ;;  %p108_p4 = scmp.eq.s32.totalorder %s273_s17, 1 }
   0x8   : > { %s444_s21 = scalar_select %p89_p1, %s382_s14, %s91_s19  }
   0x9   : > { %p446_p5 = por %p102_p2, %p101_p0  ;;  %p450_p6 = por %p108_p4, %p107_p3 }
   0xa   : > { %p276_p7 = scmp.ge.s32.totalorder %s386_s15, 1  ;;  %p139_p8 = scmp.lt.s32.totalorder %s386_s15, 3 }
   0xc   : > { %p140_p9 = pnand %p276_p7, %p139_p8 }
   0xd   : > { %p162_p10 = scmp.lt.s32.totalorder (!%p140_p9), %s429_s16, 1  ;;  %s159_s4 = sand.u32 (!%p140_p9), 1, %s378_s13  }
   0xe   : > { %143 = sbr.rel (%p140_p9) target bundleno = 155 (0x9b), region = 32  ;;  %s277_s5 = sshll.u32 (!%p140_p9), %s159_s4, 3 }
   0xf   : > { %s282_s6 = sshll.u32 (!%p140_p9), %s429_s16, 3  ;;  %s161_s17 = scalar_lea.vmem (!%p140_p9), [#allocation2], %s277_s5 }
  0x10   : > { %s209_s9 = scalar_lea.hbm (!%p140_p9), %s502_s3, %s282_s6  ;;  %s211_s19 = sshll.u32 (!%p140_p9), %s161_s17, 4  ;;  %s212_s19 = int_to_ptr.vmem [resolvable:$true] %s211_s19 }
  0x11   : > { %s213_s20 = sshll.u32 (!%p140_p9), %s209_s9, 4  ;;  %s199_s24 = scalar_lea.sflag (!%p140_p9), [#allocation3], %s159_s4  ;;  %s214_s20 = int_to_ptr.hbm [resolvable:$true] %s213_s20 }
  0x12   : > { %s338_s25 = sshra.s32 (!%p140_p9), %s214_s20, 4  ;;  %s344_s28 = scalar_lea.hbm (!%p140_p9), %s502_s3, 16  ;;  %s339_s25 = int_to_ptr.hbm [resolvable:$true] %s338_s25 }
  0x13   : > { %v167_v0 = vld [vmem:[%s500_s1] sm:$0xf]  ;;  %vm173_vm0 = vcmask 1043456   ;;  %s163_s26 = scalar_select %p162_p10, %s429_s16, 1  ;;  %vm169_vm1 = vcmask 31744  }
  0x14   : > { %279 = vmatpush.msk.msra.mxu0 %vm173_vm0, %v167_v0  ;;  %v168_v2 = vld [vmem:[%s501_s2] sm:$0xff]  ;;  %s340_s16 = scalar_lea.hbm %s339_s25, 8  ;;  %p345_p0 = scmp.lt.s32.totalorder %s339_s25, %s502_s3 }
  0x15   : > { %s278_s27 = sshll.u32 %s163_s26, 3  ;;  %p341_p11 = scmp.ne.s32.totalorder %s339_s25, %s340_s16 }
  0x16   : > { %s165_s30 = scalar_lea.vmem %s499_s0, %s278_s27  ;;  %p346_p1 = scmp.lt.s32.totalorder %s344_s28, %s340_s16 }
  0x17   : > { %v166_v1 = vld [vmem:[%s165_s30] sm:$0xff]  ;;  %p342_p12 = pnand %p341_p11, %p446_p5 }
  0x18   : > { %280 = vmatmul.msk.f32.vlgmr.msra.gmra.mxu0 %vm169_vm1, %v166_v1  ;;  %p347_p2 = por %p346_p1, %p345_p0 }
  0x19   : > { %p343_p13 = pneg %p342_p12 }
  0x1b   : > { %p348_p3 = pnand %p347_p2, %p343_p13 }
  0x95   : > { %v194_v3 = vpop.f32.mrf.mxu0 }
  0x96   : > { %v195_v4 = vadd.f32 %v194_v3, %v168_v2 }
  0x98   : > { %197 = vst [vmem:[%s161_s17] sm:$0xff] %v195_v4 }
  0x99   : > { %351 = shalt.err (!%p348_p3)
}
  0x9a   : > { %285 = dma.vmem_to_hbm [thread:$0]  (%p446_p5), %s212_s19, 128, %s214_s20, %s199_s24  }
  0x9b PF: > { %p291_p4 = scmp.ge.s32.totalorder %s386_s15, 2  ;;  %s225_s4 = sand.u32 1, %s374_s12  }
  0x9c   : > { %s226_s5 = scalar_lea.sflag [#allocation3], %s225_s4 }
  0x9d   : > { %p288_p7 = pnand %p291_p4, %p450_p6 }
  0x9f   : > { %p289_p8 = pneg %p288_p7 }
  0xa1   : > { %369 = dma.done.wait (%p289_p8), %s226_s5, 128  }
  0xa2   : > { %371 = vsyncadd (%p289_p8), %s226_s5, 4294967168  ;;  %p13_p9 = scmp.ge.s32.totalorder %s433_s18, 4   ;;  %s505_s12 = smov %s378_s13 }
  0xa3   : > { %s506_s13 = smov %s382_s14  ;;  %s507_s14 = smov %s444_s21 }
  0xa4   : > { %s508_s15 = smov %s433_s18  ;;  %15 = sbr.rel (!%p13_p9) target bundleno = 3 (0x3), region = 67 }
  0xa9   :  { %232 = vsyncpa [#allocation3], 1 }
  0xaa   :  { %234 = vsyncpa [#allocation3 + $0x1], 1 }

</bundles_post_ra>
